<compile_context>
chip_gen: v5e
topology: v5e:2x2
jax: 0.10.0
libtpu: 0.0.40
codegen_flags: <defaults>
</compile_context>

<pallas_src>
import math
import functools

import jax
import jax.numpy as jnp
from jax.experimental import pallas as pl
from jax.experimental.pallas import tpu as pltpu


def _round_up(v, m):
    return ((v + m - 1) // m) * m


def _cdiv(a, b):
    return -(-a // b)


def _vmem_capacity_bytes():
    try:
        info_fn = getattr(pltpu, "get_tpu_info", None)
        if info_fn is not None:
            cap = getattr(info_fn(), "vmem_capacity_bytes", None)
            if cap:
                return int(cap)
    except Exception:
        pass
    return 64 << 20  # conservative default: v7x per-TensorCore VMEM


def _device_kind():
    try:
        return jax.devices()[0].device_kind.lower()
    except Exception:
        return ""


def _mxu_contract_align():
    # v6e / v7x: 2x256x256 MXU -> prefer 256 alignment on the contracting dim;
    # v5e: 4x128^2 -> 128 is already optimal.
    kind = _device_kind()
    if "v5 lite" in kind or "v5e" in kind or "v5litepod" in kind:
        return 128
    return 256


def _num_tensorcores():
    # v7x has 2 TensorCores per chip sharing "parallel" grid axes.
    return 2 if "v7" in _device_kind() else 1


def _vmem_budget_and_cap():
    cap = _vmem_capacity_bytes()
    if cap <= (64 << 20):
        budget = max(cap - (16 << 20), 8 << 20)     # ~48 MiB on v7x (compiler headroom)
    else:
        budget = min(cap - (18 << 20), 110 << 20)   # ~110 MiB on v5e / v6e
    return budget, cap


def _footprint_bytes(tb, tn, Kp, grid_j, act_bytes, mm_bytes,
                     cache_xz, single_buffer_invariants):
    """Bytes of VMEM the pipelined kernel needs for one configuration."""
    inv_buf = 1 if single_buffer_invariants else 2
    w_buf = inv_buf if grid_j == 1 else 2
    f = 0
    f += 2 * (tb * Kp * act_bytes) * 2        # x, eps1 (double-buffered)
    f += (tb * tn * act_bytes) * 2            # eps2
    f += (tb * tn * 4) * 2                    # out (f32)
    f += (2 * Kp * 4) * inv_buf               # packed dropout mu / std row
    f += (2 * tn * 4) * w_buf                 # packed bias mu / var row
    f += 2 * (Kp * tn * mm_bytes) * w_buf     # weight_mu^T and exp(weight_logvar)^T
    if cache_xz:
        f += 2 * tb * Kp * mm_bytes           # xz / xz^2 scratch cache
    return f


def _select_tiles(B, Kp, Np_min, act_bytes, mm_bytes, budget, single_buffer_invariants):
    """Pick the largest (tb, tn) whose double-buffered footprint fits the VMEM budget.

    Preference order: keep tb as large as possible (fewer weight-slab re-streams across
    batch tiles), then the largest tn that still fits.
    """
    Bp8 = _round_up(B, 8)
    tb_cands = sorted({min(v, Bp8) for v in (512, 256, 128, 64, 32, 16, 8)},
                      reverse=True)
    tn_cands = []
    t = Np_min
    while t >= 128:
        tn_cands.append(t)
        if t == 128:
            break
        nxt = _round_up(t // 2, 128)
        if nxt >= t:
            break
        t = nxt

    best = None
    for tb in tb_cands:
        for tn in tn_cands:
            gj = _cdiv(Np_min, tn)
            fp = _footprint_bytes(tb, tn, Kp, gj, act_bytes, mm_bytes,
                                  cache_xz=(gj > 1),
                                  single_buffer_invariants=single_buffer_invariants)
            if fp <= budget:
                return tb, tn
            if best is None or fp < best[2]:
                best = (tb, tn, fp)
    # Nothing fits the budget: fall back to the smallest footprint and let
    # vmem_limit_bytes absorb it.
    # TODO(synk): add a K-tiled path (third "arbitrary" grid axis + f32 accumulator
    # scratch with pl.when init/finalize) so very large in_features does not force
    # tiny batch tiles.
    return best[0], best[1]


def kl_forward_kernel(x_ref, eps1_ref, eps2_ref, drow_ref, brow_ref,
                      wmu_ref, wvar_ref, out_ref, *scratch_refs, cache_xz):
    f32 = jnp.float32
    mm_dtype = wmu_ref.dtype
    dmu = drow_ref[0:1, :]          # (1, Kp)  dropout_mu
    dstd = drow_ref[1:2, :]         # (1, Kp)  exp(0.5 * dropout_logvar)
    bmu = brow_ref[0:1, :]          # (1, tn)  bias_mu
    bvar = brow_ref[1:2, :]         # (1, tn)  exp(bias_logvar)

    def compute_xz():
        x = x_ref[...].astype(f32)
        eps1 = eps1_ref[...].astype(f32)
        z = dmu + dstd * eps1                      # reparameterize(dropout_mu, dropout_logvar)
        xz = x * z
        return xz.astype(mm_dtype), (xz * xz).astype(mm_dtype)

    if cache_xz:
        # N is tiled: compute xz / xz^2 once per batch tile (j == 0) and reuse from VMEM.
        xz_ref, xz2_ref = scratch_refs

        @pl.when(pl.program_id(1) == 0)
        def _():
            xz_mm_new, xz2_mm_new = compute_xz()
            xz_ref[...] = xz_mm_new
            xz2_ref[...] = xz2_mm_new

        xz_mm = xz_ref[...]
        xz2_mm = xz2_ref[...]
    else:
        xz_mm, xz2_mm = compute_xz()

    # mu activation: linear(xz, weight_mu, bias_mu)
    mu_act = jnp.dot(xz_mm, wmu_ref[...], preferred_element_type=f32) + bmu
    # variance activation: linear(xz^2, exp(weight_logvar), exp(bias_logvar))
    var_act = jnp.dot(xz2_mm, wvar_ref[...], preferred_element_type=f32) + bvar
    # reparameterize(mu, log(var)) = mu + sqrt(var) * eps2
    eps2 = eps2_ref[...].astype(f32)
    out_ref[...] = (mu_act + jnp.sqrt(var_act) * eps2).astype(out_ref.dtype)


@functools.partial(jax.jit, static_argnames=("tb", "tn", "matmul_dtype",
                                              "act_dtype", "single_buffer_invariants"))
def kl_layers_forward(x, eps1, eps2, dropout_mu, dropout_logvar,
                      weight_mu, weight_logvar, bias_mu, bias_logvar,
                      tb=None, tn=None, matmul_dtype=jnp.bfloat16,
                      act_dtype=None, single_buffer_invariants=True):
    f32 = jnp.float32
    if act_dtype is None:
        act_dtype = matmul_dtype
    B, K = x.shape
    N = weight_mu.shape[0]

    # ---- grid-invariant precompute (hoisted out of the kernel body) ----
    dropout_std = jnp.exp(0.5 * dropout_logvar.astype(f32))      # (K,)
    weight_mu_t = weight_mu.astype(f32).T                        # (K, N)
    weight_var_t = jnp.exp(weight_logvar.astype(f32)).T          # (K, N)
    bias_var = jnp.exp(bias_logvar.astype(f32))                  # (N,)

    # ---- alignment and tile selection from the per-generation VMEM budget ----
    k_align = _mxu_contract_align()
    Kp = _round_up(K, k_align if K >= k_align else 128)
    Np_min = _round_up(N, 128)   # keep N at 128 granularity: wider padding only adds DMA bytes
    act_bytes = jnp.dtype(act_dtype).itemsize
    mm_bytes = jnp.dtype(matmul_dtype).itemsize
    budget, vmem_cap = _vmem_budget_and_cap()

    auto_tb, auto_tn = _select_tiles(B, Kp, Np_min, act_bytes, mm_bytes,
                                     budget, single_buffer_invariants)
    Bp8 = _round_up(B, 8)
    tb = auto_tb if tb is None else _round_up(min(max(tb, 8), Bp8), 8)
    tn = auto_tn if tn is None else _round_up(min(max(tn, 128), Np_min), 128)

    grid_i = _cdiv(B, tb)
    grid_j = _cdiv(Np_min, tn)

    # ---- v7x: make sure both TensorCores get work when the grid degenerates ----
    if _num_tensorcores() > 1 and grid_i == 1 and grid_j == 1:
        if Bp8 >= 16:
            tb = _round_up(_cdiv(B, 2), 8)
        elif Np_min >= 256:
            tn = _round_up(Np_min // 2, 128)
        grid_i = _cdiv(B, tb)
        grid_j = _cdiv(Np_min, tn)

    Bp = grid_i * tb
    Np = grid_j * tn

    cache_xz = grid_j > 1
    j_sem = "arbitrary" if cache_xz else "parallel"
    if cache_xz and grid_i == 1 and _num_tensorcores() > 1:
        # Prefer megacore sharding of the j axis over the xz cache when the batch
        # axis cannot be split.
        cache_xz = False
        j_sem = "parallel"

    # ---- zero-pad everything to aligned shapes ----
    def pad2(a, r, c):
        return jnp.pad(a, ((0, r - a.shape[0]), (0, c - a.shape[1])))

    x_p = pad2(x.astype(act_dtype), Bp, Kp)
    eps1_p = pad2(eps1.astype(act_dtype), Bp, Kp)
    eps2_p = pad2(eps2.astype(act_dtype), Bp, Np)
    drow_p = pad2(jnp.stack([dropout_mu.astype(f32), dropout_std]), 2, Kp)
    brow_p = pad2(jnp.stack([bias_mu.astype(f32), bias_var]), 2, Np)
    wmu_p = pad2(weight_mu_t, Kp, Np).astype(matmul_dtype)
    wvar_p = pad2(weight_var_t, Kp, Np).astype(matmul_dtype)

    footprint = _footprint_bytes(tb, tn, Kp, grid_j, act_bytes, mm_bytes,
                                 cache_xz, single_buffer_invariants)
    vmem_limit = int(min(max(footprint + (8 << 20), 24 << 20), vmem_cap))

    # ---- BlockSpecs: single-buffer grid-invariant operands ----
    has_buffered = hasattr(pl, "Buffered")

    def spec(shape, index_map, invariant=False):
        if single_buffer_invariants and invariant and has_buffered:
            return pl.BlockSpec(shape, index_map, pipeline_mode=pl.Buffered(1))
        return pl.BlockSpec(shape, index_map)

    w_invariant = (grid_j == 1)
    in_specs = [
        pl.BlockSpec((tb, Kp), lambda i, j: (i, 0)),                 # x
        pl.BlockSpec((tb, Kp), lambda i, j: (i, 0)),                 # eps1
        pl.BlockSpec((tb, tn), lambda i, j: (i, j)),                 # eps2
        spec((2, Kp), lambda i, j: (0, 0), invariant=True),          # dropout mu / std
        spec((2, tn), lambda i, j: (0, j), invariant=w_invariant),   # bias mu / var
        spec((Kp, tn), lambda i, j: (0, j), invariant=w_invariant),  # weight_mu^T
        spec((Kp, tn), lambda i, j: (0, j), invariant=w_invariant),  # exp(weight_logvar)^T
    ]
    out_spec = pl.BlockSpec((tb, tn), lambda i, j: (i, j))
    scratch_shapes = ([pltpu.VMEM((tb, Kp), matmul_dtype)] * 2) if cache_xz else []

    out_p = pl.pallas_call(
        functools.partial(kl_forward_kernel, cache_xz=cache_xz),
        out_shape=jax.ShapeDtypeStruct((Bp, Np), f32),
        grid_spec=pltpu.PrefetchScalarGridSpec(
            num_scalar_prefetch=0,
            grid=(grid_i, grid_j),
            in_specs=in_specs,
            out_specs=out_spec,
            scratch_shapes=scratch_shapes,
        ),
        compiler_params=pltpu.CompilerParams(
            dimension_semantics=("parallel", j_sem),
            vmem_limit_bytes=vmem_limit),
    )(x_p, eps1_p, eps2_p, drow_p, brow_p, wmu_p, wvar_p)

    return out_p[:B, :N]


def kl_layers_forward_ref(x, eps1, eps2, dropout_mu, dropout_logvar,
                          weight_mu, weight_logvar, bias_mu, bias_logvar):
    """Pure-JAX (f32) reference for correctness checking."""
    z = dropout_mu[None, :] + jnp.exp(0.5 * dropout_logvar)[None, :] * eps1
    xz = x * z
    mu_act = xz @ weight_mu.T + bias_mu[None, :]
    var_act = (xz * xz) @ jnp.exp(weight_logvar).T + jnp.exp(bias_logvar)[None, :]
    return mu_act + jnp.sqrt(var_act) * eps2


def _make_case(key, B, in_features, out_features):
    kx, ke1, ke2, kdm, kdl, kwm, kwl, kbl = jax.random.split(key, 8)
    stdv = 1.0 / math.sqrt(in_features)
    # Parameter init matching KlLayers.reset_parameters.
    dropout_mu = 1.0 + 0.01 * jax.random.normal(kdm, (in_features,), jnp.float32)
    dropout_logvar = -9.0 + 0.01 * jax.random.normal(kdl, (in_features,), jnp.float32)
    weight_mu = stdv * jax.random.normal(kwm, (out_features, in_features), jnp.float32)
    weight_logvar = -9.0 + 0.01 * jax.random.normal(kwl, (out_features, in_features), jnp.float32)
    bias_mu = jnp.zeros((out_features,), jnp.float32)
    bias_logvar = -9.0 + 0.01 * jax.random.normal(kbl, (out_features,), jnp.float32)
    # Inputs and reparameterization noise (torch FloatTensor(...).normal_() -> N(0,1)),
    # sampled host-side and passed in explicitly.
    x = jax.random.normal(kx, (B, in_features), jnp.float32)
    eps1 = jax.random.normal(ke1, (B, in_features), jnp.float32)
    eps2 = jax.random.normal(ke2, (B, out_features), jnp.float32)
    return (x, eps1, eps2, dropout_mu, dropout_logvar,
            weight_mu, weight_logvar, bias_mu, bias_logvar)


if __name__ == "__main__":
    key = jax.random.PRNGKey(0)
    k1, k2, k3 = jax.random.split(key, 3)

    # Case 1: small aligned-ish shapes (B=8, in=32, out=32).
    args1 = _make_case(k1, B=8, in_features=32, out_features=32)
    ref1 = kl_layers_forward_ref(*args1)

    out1_bf16 = jax.block_until_ready(kl_layers_forward(*args1))       # bf16 MXU + streams
    assert out1_bf16.shape == ref1.shape
    assert jnp.max(jnp.abs(out1_bf16 - ref1)) < 1e-1, "bf16 mismatch vs reference"

    out1_f32 = jax.block_until_ready(
        kl_layers_forward(*args1, matmul_dtype=jnp.float32))            # f32 everywhere
    assert jnp.max(jnp.abs(out1_f32 - ref1)) < 2e-3, "f32 mismatch vs reference"

    # Case 2: unaligned shapes + tb that does not divide B (padding path; N fits one
    # tile so weight slabs / bias rows are single-buffered).
    args2 = _make_case(k2, B=10, in_features=40, out_features=48)
    ref2 = kl_layers_forward_ref(*args2)
    out2 = jax.block_until_ready(kl_layers_forward(*args2, tb=8))
    assert out2.shape == ref2.shape
    assert jnp.max(jnp.abs(out2 - ref2)) < 1e-1, "padded-case mismatch vs reference"

    # Case 3: N-tiled grid (exercises the xz / xz^2 VMEM cache + 'arbitrary' j axis).
    args3 = _make_case(k3, B=24, in_features=160, out_features=384)
    ref3 = kl_layers_forward_ref(*args3)
    out3 = jax.block_until_ready(kl_layers_forward(*args3, tb=16, tn=128))
    assert out3.shape == ref3.shape
    assert jnp.max(jnp.abs(out3 - ref3)) < 1e-1, "N-tiled-case mismatch vs reference"

    print("KERNEL_OK")
</pallas_src>

<mosaic_0001>
module attributes {stable_mosaic.version = 11 : i64} {
  func.func @kl_forward_kernel(%arg0: i32, %arg1: i32, %arg2: memref<8x128xbf16, #tpu.memory_space<vmem>>, %arg3: memref<8x128xbf16, #tpu.memory_space<vmem>>, %arg4: memref<8x128xbf16, #tpu.memory_space<vmem>>, %arg5: memref<2x128xf32, #tpu.memory_space<vmem>>, %arg6: memref<2x128xf32, #tpu.memory_space<vmem>>, %arg7: memref<128x128xbf16, #tpu.memory_space<vmem>>, %arg8: memref<128x128xbf16, #tpu.memory_space<vmem>>, %arg9: memref<8x128xf32, #tpu.memory_space<vmem>>) attributes {dimension_semantics = [#tpu.dimension_semantics<parallel>, #tpu.dimension_semantics<parallel>], iteration_bounds = array<i64: 1, 1>, scalar_prefetch = 0 : i64, scratch_operands = 0 : i64, tpu.core_type = #tpu.core_type<tc>, window_params = [{transform_indices = @transform_0, window_bounds = array<i64: 8, 128>}, {transform_indices = @transform_1, window_bounds = array<i64: 8, 128>}, {transform_indices = @transform_2, window_bounds = array<i64: 8, 128>}, {pipeline_mode = #tpu.pipeline_mode<synchronous>, transform_indices = @transform_3, window_bounds = array<i64: 2, 128>}, {pipeline_mode = #tpu.pipeline_mode<synchronous>, transform_indices = @transform_4, window_bounds = array<i64: 2, 128>}, {pipeline_mode = #tpu.pipeline_mode<synchronous>, transform_indices = @transform_5, window_bounds = array<i64: 128, 128>}, {pipeline_mode = #tpu.pipeline_mode<synchronous>, transform_indices = @transform_6, window_bounds = array<i64: 128, 128>}, {transform_indices = @transform_7, window_bounds = array<i64: 8, 128>}]} {
    %c0 = arith.constant 0 : index
    %c0_0 = arith.constant 0 : index
    %0 = vector.load %arg5[%c0, %c0_0] : memref<2x128xf32, #tpu.memory_space<vmem>>, vector<1x128xf32>
    %c1 = arith.constant 1 : index
    %c0_1 = arith.constant 0 : index
    %1 = vector.load %arg5[%c1, %c0_1] : memref<2x128xf32, #tpu.memory_space<vmem>>, vector<1x128xf32>
    %c0_2 = arith.constant 0 : index
    %c0_3 = arith.constant 0 : index
    %2 = vector.load %arg6[%c0_2, %c0_3] : memref<2x128xf32, #tpu.memory_space<vmem>>, vector<1x128xf32>
    %c1_4 = arith.constant 1 : index
    %c0_5 = arith.constant 0 : index
    %3 = vector.load %arg6[%c1_4, %c0_5] : memref<2x128xf32, #tpu.memory_space<vmem>>, vector<1x128xf32>
    %c0_6 = arith.constant 0 : index
    %c0_7 = arith.constant 0 : index
    %4 = vector.load %arg2[%c0_6, %c0_7] : memref<8x128xbf16, #tpu.memory_space<vmem>>, vector<8x128xbf16>
    %5 = arith.extf %4 : vector<8x128xbf16> to vector<8x128xf32>
    %c0_8 = arith.constant 0 : index
    %c0_9 = arith.constant 0 : index
    %6 = vector.load %arg3[%c0_8, %c0_9] : memref<8x128xbf16, #tpu.memory_space<vmem>>, vector<8x128xbf16>
    %7 = arith.extf %6 : vector<8x128xbf16> to vector<8x128xf32>
    %8 = vector.broadcast %1 : vector<1x128xf32> to vector<8x128xf32>
    %9 = arith.mulf %8, %7 : vector<8x128xf32>
    %10 = vector.broadcast %0 : vector<1x128xf32> to vector<8x128xf32>
    %11 = arith.addf %10, %9 : vector<8x128xf32>
    %12 = arith.mulf %5, %11 : vector<8x128xf32>
    %13 = arith.truncf %12 : vector<8x128xf32> to vector<8x128xbf16>
    %14 = arith.mulf %12, %12 : vector<8x128xf32>
    %15 = arith.truncf %14 : vector<8x128xf32> to vector<8x128xbf16>
    %c0_10 = arith.constant 0 : index
    %c0_11 = arith.constant 0 : index
    %16 = vector.load %arg7[%c0_10, %c0_11] : memref<128x128xbf16, #tpu.memory_space<vmem>>, vector<128x128xbf16>
    %cst = arith.constant dense<0.000000e+00> : vector<8x128xf32>
    %17 = tpu.matmul %13, %16, %cst {dimension_numbers = #tpu.dot_dimension_numbers<[1], [0], [0], [1], [0, 0, 1, 1], [], []>} : vector<8x128xbf16>, vector<128x128xbf16>, vector<8x128xf32> -> vector<8x128xf32>
    %18 = vector.broadcast %2 : vector<1x128xf32> to vector<8x128xf32>
    %19 = arith.addf %17, %18 : vector<8x128xf32>
    %c0_12 = arith.constant 0 : index
    %c0_13 = arith.constant 0 : index
    %20 = vector.load %arg8[%c0_12, %c0_13] : memref<128x128xbf16, #tpu.memory_space<vmem>>, vector<128x128xbf16>
    %cst_14 = arith.constant dense<0.000000e+00> : vector<8x128xf32>
    %21 = tpu.matmul %15, %20, %cst_14 {dimension_numbers = #tpu.dot_dimension_numbers<[1], [0], [0], [1], [0, 0, 1, 1], [], []>} : vector<8x128xbf16>, vector<128x128xbf16>, vector<8x128xf32> -> vector<8x128xf32>
    %22 = vector.broadcast %3 : vector<1x128xf32> to vector<8x128xf32>
    %23 = arith.addf %21, %22 : vector<8x128xf32>
    %c0_15 = arith.constant 0 : index
    %c0_16 = arith.constant 0 : index
    %24 = vector.load %arg4[%c0_15, %c0_16] : memref<8x128xbf16, #tpu.memory_space<vmem>>, vector<8x128xbf16>
    %25 = arith.extf %24 : vector<8x128xbf16> to vector<8x128xf32>
    %26 = math.sqrt %23 : vector<8x128xf32>
    %27 = arith.mulf %26, %25 : vector<8x128xf32>
    %28 = arith.addf %19, %27 : vector<8x128xf32>
    %c0_17 = arith.constant 0 : index
    %c0_18 = arith.constant 0 : index
    %29 = vector.load %arg9[%c0_17, %c0_18] : memref<8x128xf32, #tpu.memory_space<vmem>>, vector<8x128xf32>
    tpu.vector_store %arg9[%c0_17, %c0_18], %28 {strides = array<i32>} : memref<8x128xf32, #tpu.memory_space<vmem>>, vector<8x128xf32>,
    return
  }
  func.func @transform_0(%arg0: i32, %arg1: i32) -> (i32, i32) {
    %c0_i32 = arith.constant 0 : i32
    %c0_i32_0 = arith.constant 0 : i32
    return %arg0, %c0_i32 : i32, i32
  }
  func.func @transform_1(%arg0: i32, %arg1: i32) -> (i32, i32) {
    %c0_i32 = arith.constant 0 : i32
    %c0_i32_0 = arith.constant 0 : i32
    return %arg0, %c0_i32 : i32, i32
  }
  func.func @transform_2(%arg0: i32, %arg1: i32) -> (i32, i32) {
    %c0_i32 = arith.constant 0 : i32
    return %arg0, %arg1 : i32, i32
  }
  func.func @transform_3(%arg0: i32, %arg1: i32) -> (i32, i32) {
    %c0_i32 = arith.constant 0 : i32
    %c0_i32_0 = arith.constant 0 : i32
    %c0_i32_1 = arith.constant 0 : i32
    return %c0_i32, %c0_i32_0 : i32, i32
  }
  func.func @transform_4(%arg0: i32, %arg1: i32) -> (i32, i32) {
    %c0_i32 = arith.constant 0 : i32
    %c0_i32_0 = arith.constant 0 : i32
    return %c0_i32, %arg1 : i32, i32
  }
  func.func @transform_5(%arg0: i32, %arg1: i32) -> (i32, i32) {
    %c0_i32 = arith.constant 0 : i32
    %c0_i32_0 = arith.constant 0 : i32
    return %c0_i32, %arg1 : i32, i32
  }
  func.func @transform_6(%arg0: i32, %arg1: i32) -> (i32, i32) {
    %c0_i32 = arith.constant 0 : i32
    %c0_i32_0 = arith.constant 0 : i32
    return %c0_i32, %arg1 : i32, i32
  }
  func.func @transform_7(%arg0: i32, %arg1: i32) -> (i32, i32) {
    %c0_i32 = arith.constant 0 : i32
    return %arg0, %arg1 : i32, i32
  }
}

</mosaic_0001>

<bundles_post_ra>
// kernel: kl_layers_forward.1
= control target key start
LH: loop header
LB: loop body
LE: loop exit
PB: predicated region body
PF: predicated region fallthrough
CT: control target
= control target key end

     0   :  { %s458_s0 = inlined_call_operand.vmem [shape: bf16[8,128], index: 0, kind: input, shape index: {}]   ;;  %s459_s1 = inlined_call_operand.vmem [shape: bf16[8,128], index: 1, kind: input, shape index: {}]   ;;  %s460_s2 = inlined_call_operand.vmem [shape: bf16[8,128], index: 2, kind: input, shape index: {}]   ;;  %s461_s3 = inlined_call_operand.vmem [shape: f32[2,128], index: 3, kind: input, shape index: {}]   ;;  %s462_s4 = inlined_call_operand.vmem [shape: f32[2,128], index: 4, kind: input, shape index: {}]   ;;  %s463_s5 = inlined_call_operand.vmem [shape: bf16[128,128], index: 5, kind: input, shape index: {}]   ;;  %s464_s6 = inlined_call_operand.vmem [shape: bf16[128,128], index: 6, kind: input, shape index: {}]   ;;  %s465_s7 = inlined_call_operand.hbm [shape: f32[8,128], index: 7, kind: output, shape index: {}]  }
   0x1   :  { %v311_v0 = vld [vmem:[%s464_s6 + $0x38] sm:$0xff]  ;;  %v310_v2 = vld [vmem:[%s464_s6 + $0x30] sm:$0xff]  ;;  %v309_v4 = vld [vmem:[%s464_s6 + $0x28] sm:$0xff] }
   0x2   :  { %v303_v1 = vld [vmem:[%s463_s5 + $0x38] sm:$0xff]  ;;  %186 = vmatpush.bf16.msra.mxu1 %v311_v0  ;;  %v302_v3 = vld [vmem:[%s463_s5 + $0x30] sm:$0xff]  ;;  %v33_v5 = vld [vmem:[%s459_s1] sm:$0xf] }
   0x3   :  { %108 = vmatpush.bf16.msra.mxu0 %v303_v1  ;;  %v301_v6 = vld [vmem:[%s463_s5 + $0x28] sm:$0xff] }
   0x6   :  { %187 = vmatpush.bf16.msra.mxu1 %v310_v2 }
   0x7   :  { %109 = vmatpush.bf16.msra.mxu0 %v302_v3 }
   0x8   :  { %12 = vsyncpa [#allocation3], 0  ;;  %v34_v7 = vunpack.c.l.bf16 %v33_v5  ;;  %v313_v8 = vld [vmem:[%s461_s3 + $0x1] ss:$0 sm:$0xff]  ;;  %v314_v12 = vld [vmem:[%s461_s3] ss:$0 sm:$0xff] }
   0x9   :  { %v308_v9 = vld [vmem:[%s464_s6 + $0x20] sm:$0xff]  ;;  %v307_v13 = vld [vmem:[%s464_s6 + $0x18] sm:$0xff]  ;;  %v306_v18 = vld [vmem:[%s464_s6 + $0x10] sm:$0xff]  ;;  %s345_s19 = smov [#allocation2]   ;;  %s223_s22 = sshll.u32 %s465_s7, 4  ;;  %s224_s22 = int_to_ptr.hbm [resolvable:$true] %s223_s22 }
   0xa   :  { %188 = vmatpush.bf16.msra.mxu1 %v309_v4  ;;  %v300_v10 = vld [vmem:[%s463_s5 + $0x20] sm:$0xff]  ;;  %v36_v11 = vmul.f32 %v313_v8, %v34_v7  ;;  %v299_v15 = vld [vmem:[%s463_s5 + $0x18] sm:$0xff]  ;;  %v298_v19 = vld [vmem:[%s463_s5 + $0x10] sm:$0xff]  ;;  %s221_s20 = sshll.u32 %s345_s19, 4  ;;  %s222_s20 = int_to_ptr.vmem [resolvable:$true] %s221_s20 }
   0xb   :  { %110 = vmatpush.bf16.msra.mxu0 %v301_v6  ;;  %v31_v14 = vld [vmem:[%s458_s0] sm:$0xf]  ;;  %v305_v21 = vld [vmem:[%s464_s6 + $0x8] sm:$0xff] }
   0xc   :  { %v32_v16 = vunpack.c.l.bf16 %v31_v14  ;;  %v38_v17 = vadd.f32 %v314_v12, %v36_v11  ;;  %v297_v22 = vld [vmem:[%s463_s5 + $0x8] sm:$0xff]  ;;  %v304_v24 = vld [vmem:[%s464_s6] sm:$0xff] }
   0xd   :  { %v296_v25 = vld [vmem:[%s463_s5] sm:$0xff] }
   0xe   :  { %189 = vmatpush.bf16.msra.mxu1 %v308_v9  ;;  %v39_v20 = vmul.f32 %v38_v17, %v32_v16  ;;  %v315_v28 = vld [vmem:[%s462_s4 + $0x1] ss:$0 sm:$0xff]  ;;  %v316_v41 = vld [vmem:[%s462_s4] ss:$0 sm:$0xff] }
   0xf   :  { %111 = vmatpush.bf16.msra.mxu0 %v300_v10  ;;  %v199_v39 = vld [vmem:[%s460_s2] sm:$0xf] }
  0x10   :  { %v41_v23 = vmul.f32 %v39_v20, %v39_v20  ;;  %v40_v27 = vpack.c.bf16 %v39_v20, %v39_v20  ;;  %v200_v42 = vunpack.c.l.bf16 %v199_v39 }
  0x12   :  { %190 = vmatpush.bf16.msra.mxu1 %v307_v13  ;;  %v42_v26 = vpack.c.bf16 %v41_v23, %v41_v23 }
  0x13   :  { %112 = vmatpush.bf16.msra.mxu0 %v299_v15 }
  0x16   :  { %191 = vmatpush.bf16.msra.mxu1 %v306_v18 }
  0x17   :  { %113 = vmatpush.bf16.msra.mxu0 %v298_v19 }
  0x1a   :  { %192 = vmatpush.bf16.msra.mxu1 %v305_v21 }
  0x1b   :  { %114 = vmatpush.bf16.msra.mxu0 %v297_v22 }
  0x1e   :  { %193 = vmatpush.bf16.msra.mxu1 %v304_v24 }
  0x1f   :  { %115 = vmatpush.bf16.msra.mxu0 %v296_v25 }
  0x21   :  { %194 = vmatmul.bf16.vlgmr.msra.gmra.mxu1 %v42_v26 }
  0x22   :  { %116 = vmatmul.bf16.vlgmr.msra.gmra.mxu0 %v40_v27 }
  0x9e   :  { %v195_v29 = vpop.f32.mrf.mxu1 }
  0x9f   :  { %v196_v30 = vadd.f32 %v315_v28, %v195_v29  ;;  %v117_v31 = vpop.f32.mrf.mxu0 }
  0xa0   :  { %v118_v47 = vadd.f32 %v316_v41, %v117_v31 }
  0xa1   :  { %317 = vrsqrt.f32 %v196_v30  ;;  %vm208_vm0 = vcmp.eq.f32.partialorder %v196_v30, inf  ;;  %v211_v44 = vand.u32 2147483648, %v196_v30  ;;  %vm210_vm1 = vcmp.eq.f32.partialorder %v196_v30, 0.0 }
  0xa6   :  { %v197_v32 = vpop.f32.mrf.mxu1 }
  0xa7   :  { %v318_v33 = vpop.eup %317  ;;  %v119_v34 = vpop.f32.mrf.mxu0 }
  0xa8   :  { %v202_v35 = vmul.f32 %v318_v33, %v196_v30 }
  0xaa   :  { %v203_v36 = vmul.f32 %v318_v33, %v202_v35 }
  0xac   :  { %v204_v37 = vmul.f32 0.5, %v203_v36 }
  0xae   :  { %v205_v38 = vsub.f32 1.5, %v204_v37 }
  0xb0   :  { %v206_v40 = vmul.f32 %v318_v33, %v205_v38 }
  0xb2   :  { %v207_v43 = vmul.f32 %v206_v40, %v196_v30 }
  0xb4   :  { %v209_v45 = vsel %vm208_vm0, %v196_v30, %v207_v43 }
  0xb5   :  { %v212_v46 = vsel %vm210_vm1, %v211_v44, %v209_v45 }
  0xb6   :  { %v213_v48 = vmul.f32 %v212_v46, %v200_v42 }
  0xb8   :  { %v214_v49 = vadd.f32 %v213_v48, %v118_v47 }
  0xba   :  { %215 = vst [vmem:[#allocation2] sm:$0xff] %v214_v49 }
  0xbb   :  { %226 = dma.vmem_to_hbm [thread:$0]  %s222_s20, 128, %s224_s22, [#allocation3]  }
  0xbc   :  { %343 = dma.done.wait [#allocation3], 128  }
  0xbd   :  { %344 = vsyncadd [#allocation3], 4294967168 }
  0xbe   :  { %231 = vsyncpa [#allocation3], 1 }

</bundles_post_ra>
